<compile_context>
chip_gen: v5e
topology: v5e:2x2
jax: 0.10.0
libtpu: 0.0.40
codegen_flags: <defaults>
</compile_context>

<pallas_src>
import math

import jax
import jax.numpy as jnp
from jax.experimental import pallas as pl
from jax.experimental.pallas import tpu as pltpu


_LANE = 128
# ~2 MiB per block; with input + output each double-buffered the pipelined
# VMEM footprint is ~8 MiB, safely under every generation's default scoped
# VMEM (v5e 16 MiB, v6e 32 MiB, v7x 32 MiB).
_BLOCK_BYTES = 2 * 1024 * 1024


def _round_up(x: int, m: int) -> int:
    return ((x + m - 1) // m) * m


def _sublane(dtype) -> int:
    # Sublane packing by dtype width: f32/i32 -> 8, bf16 -> 16, int8/fp8 -> 32.
    return {4: 8, 2: 16, 1: 32}.get(jnp.dtype(dtype).itemsize, 8)


# ----------------------------- Pallas kernel -----------------------------

def _flatten_copy_kernel(x_ref, o_ref):
    # Pure tile copy: (TM, TF) in VMEM -> (TM, TF) out.
    o_ref[...] = x_ref[...]


# ------------------------------ wrapper ----------------------------------

def flatten(x):
    """Pallas equivalent of torch `x.view(x.size(0), -1)` for contiguous x."""
    N = x.shape[0]
    F = int(math.prod(x.shape[1:])) if x.ndim > 1 else 1

    # Row-major flatten of a contiguous array == torch .view(N, -1); this
    # reshape is metadata-only. The kernel does the materializing copy.
    x2 = x.reshape(N, F)

    itemsize = jnp.dtype(x2.dtype).itemsize
    sub = _sublane(x2.dtype)

    # Byte-budgeted tiling (no explicit padding anywhere):
    #   1) provisional row tile, capped at 256 rows,
    #   2) feature tile fills the byte budget for that row tile (128-lane mult),
    #   3) row tile regrows to fill leftover budget when F is small.
    # Block dims are always multiples of (sublane, 128), so ragged edges are
    # handled by Pallas' masked edge blocks — never by padding the array.
    tm0 = min(_round_up(max(N, 1), sub), 256)
    tf_budget = max(_LANE, (_BLOCK_BYTES // (tm0 * itemsize)) // _LANE * _LANE)
    TF = min(_round_up(max(F, 1), _LANE), tf_budget)
    tm_budget = max(sub, (_BLOCK_BYTES // (TF * itemsize)) // sub * sub)
    TM = min(_round_up(max(N, 1), sub), tm_budget)

    grid = (pl.cdiv(N, TM), pl.cdiv(F, TF))

    return pl.pallas_call(
        _flatten_copy_kernel,
        out_shape=jax.ShapeDtypeStruct((N, F), x2.dtype),
        grid=grid,
        in_specs=[pl.BlockSpec((TM, TF), lambda i, j: (i, j))],
        out_specs=pl.BlockSpec((TM, TF), lambda i, j: (i, j)),
        compiler_params=pltpu.CompilerParams(
            dimension_semantics=("parallel", "parallel")),
    )(x2)


# --------------------------------- main -----------------------------------

if __name__ == "__main__":
    key = jax.random.PRNGKey(0)
    # Small NCHW input consistent with the module (any >=1-D tensor works).
    x = jax.random.normal(key, (2, 4, 16, 16), jnp.float32)

    out = jax.jit(flatten)(x)
    out = jax.block_until_ready(out)

    ref = x.reshape(x.shape[0], -1)  # torch .view(N, -1) reference
    assert out.shape == (2, 4 * 16 * 16)
    assert bool(jnp.array_equal(out, ref))
    print("KERNEL_OK")
</pallas_src>

<mosaic_0001>
module attributes {stable_mosaic.version = 11 : i64} {
  func.func @_flatten_copy_kernel(%arg0: i32, %arg1: i32, %arg2: memref<8x1024xf32, #tpu.memory_space<vmem>>, %arg3: memref<8x1024xf32, #tpu.memory_space<vmem>>) attributes {dimension_semantics = [#tpu.dimension_semantics<parallel>, #tpu.dimension_semantics<parallel>], iteration_bounds = array<i64: 1, 1>, scalar_prefetch = 0 : i64, scratch_operands = 0 : i64, tpu.core_type = #tpu.core_type<tc>, window_params = [{transform_indices = @transform_0, window_bounds = array<i64: 8, 1024>}, {transform_indices = @transform_1, window_bounds = array<i64: 8, 1024>}]} {
    %c0 = arith.constant 0 : index
    %c0_0 = arith.constant 0 : index
    %0 = vector.load %arg2[%c0, %c0_0] : memref<8x1024xf32, #tpu.memory_space<vmem>>, vector<8x1024xf32>
    %c0_1 = arith.constant 0 : index
    %c0_2 = arith.constant 0 : index
    %1 = vector.load %arg3[%c0_1, %c0_2] : memref<8x1024xf32, #tpu.memory_space<vmem>>, vector<8x1024xf32>
    tpu.vector_store %arg3[%c0_1, %c0_2], %0 {strides = array<i32>} : memref<8x1024xf32, #tpu.memory_space<vmem>>, vector<8x1024xf32>,
    return
  }
  func.func @transform_0(%arg0: i32, %arg1: i32) -> (i32, i32) {
    %c0_i32 = arith.constant 0 : i32
    return %arg0, %arg1 : i32, i32
  }
  func.func @transform_1(%arg0: i32, %arg1: i32) -> (i32, i32) {
    %c0_i32 = arith.constant 0 : i32
    return %arg0, %arg1 : i32, i32
  }
}

</mosaic_0001>

<bundles_post_ra>
// kernel: flatten.1
= control target key start
LH: loop header
LB: loop body
LE: loop exit
PB: predicated region body
PF: predicated region fallthrough
CT: control target
= control target key end

     0   :  { %6 = vsyncpa [#allocation3], 0  ;;  %s112_s0 = inlined_call_operand.vmem [shape: f32[2,1024], index: 0, kind: input, shape index: {}]   ;;  %s113_s1 = inlined_call_operand.hbm [shape: f32[2,1024], index: 1, kind: output, shape index: {}]  }
   0x1   :  { %v9_v0 = vld [vmem:[%s112_s0] sm:$0xff]  ;;  %v10_v1 = vld [vmem:[%s112_s0 + $0x8] sm:$0xff]  ;;  %v11_v2 = vld [vmem:[%s112_s0 + $0x10] sm:$0xff] }
   0x2   :  { %17 = vst [vmem:[#allocation2] sm:$0xff] %v9_v0  ;;  %v12_v3 = vld [vmem:[%s112_s0 + $0x18] sm:$0xff]  ;;  %v13_v4 = vld [vmem:[%s112_s0 + $0x20] sm:$0xff]  ;;  %v14_v5 = vld [vmem:[%s112_s0 + $0x28] sm:$0xff] }
   0x3   :  { %18 = vst [vmem:[#allocation2 + $0x8] sm:$0xff] %v10_v1  ;;  %v15_v6 = vld [vmem:[%s112_s0 + $0x30] sm:$0xff]  ;;  %v16_v7 = vld [vmem:[%s112_s0 + $0x38] sm:$0xff] }
   0x4   :  { %19 = vst [vmem:[#allocation2 + $0x10] sm:$0xff] %v11_v2 }
   0x5   :  { %20 = vst [vmem:[#allocation2 + $0x18] sm:$0xff] %v12_v3 }
   0x6   :  { %21 = vst [vmem:[#allocation2 + $0x20] sm:$0xff] %v13_v4 }
   0x7   :  { %22 = vst [vmem:[#allocation2 + $0x28] sm:$0xff] %v14_v5 }
   0x8   :  { %23 = vst [vmem:[#allocation2 + $0x30] sm:$0xff] %v15_v6 }
   0x9   :  { %24 = vst [vmem:[#allocation2 + $0x38] sm:$0xff] %v16_v7 }
   0xa   :  { %28 = vsyncadd [#allocation3], 768  ;;  %s31_s24 = sshll.u32 %s113_s1, 4  ;;  %s72_s25 = smov [#allocation2]   ;;  %s32_s24 = int_to_ptr.hbm [resolvable:$true] %s31_s24 }
   0xb   :  { %s29_s26 = sshll.u32 %s72_s25, 4  ;;  %s73_s27 = smov 256   ;;  %s30_s26 = int_to_ptr.vmem [resolvable:$true] %s29_s26 }
   0xc   :  { %s74_s28 = smov 16  }
   0xd   :  { %37 = dma.vmem_to_hbm [thread:$0]  %s30_s26, 256, %s32_s24, [#allocation3], %s73_s27, %s73_s27, %s74_s28  }
   0xe   :  { %70 = dma.done.wait [#allocation3], 1024  }
   0xf   :  { %71 = vsyncadd [#allocation3], 4294966272 }
  0x10   :  { %42 = vsyncpa [#allocation3], 1 }

</bundles_post_ra>
